<compile_context>
chip_gen: v5e
topology: v5e:2x2
jax: 0.10.0
libtpu: 0.0.40
codegen_flags: <defaults>
</compile_context>

<pallas_src>
import functools

import jax
import jax.numpy as jnp
from jax.experimental import pallas as pl
from jax.experimental.pallas import tpu as pltpu

IMAGENET_MEAN = (0.485, 0.456, 0.406)
IMAGENET_STD = (0.229, 0.224, 0.225)

K_PACK = 32  # 3*3*C = 27 conv taps, zero-padded to 32 on the MXU contraction dim


def _round_up(x, m):
    return ((x + m - 1) // m) * m


def _fused_forward_kernel(
    p_ref,      # (1, tile_m, 32)   packed conv patches (kh,kw,c folded into K), bf16
    w_ref,      # (32, f_pad)       normalize-folded conv weights, bf16
    b_ref,      # (1, f_pad)        normalize-folded conv bias, f32
    fcw_ref,    # (f_pad, cls_pad)  zero-padded FC weights, f32
    fcb_ref,    # (1, cls_pad)      zero-padded FC bias, f32
    o_ref,      # (1, 8, cls_pad)   softmax probs (broadcast over 8 sublanes), f32
    pool8_ref,  # scratch (8, f_pad) f32 : sublane-partial spatial sum of relu(conv)
    *,
    total_rows, dot_m, subs, tile_m, f_pad, cls_pad, n_classes, inv_hw, needs_mask,
):
    m = pl.program_id(1)

    @pl.when(m == 0)
    def _init():
        pool8_ref[...] = jnp.zeros_like(pool8_ref)

    w = w_ref[...]          # hoisted out of the tile loop
    bias = b_ref[...]

    def sub_body(s, part):
        base = pl.multiple_of(s * dot_m, dot_m)
        lhs = p_ref[0, pl.ds(base, dot_m), :]                        # (dot_m, 32) bf16
        acc = jnp.dot(lhs, w, preferred_element_type=jnp.float32)    # (dot_m, f_pad) f32
        acc = jnp.maximum(acc + bias, 0.0)
        if needs_mask:  # zero out padded pixel rows so they don't pollute the pool
            row = jax.lax.broadcasted_iota(jnp.int32, (dot_m, 1), 0)
            acc = jnp.where(row + (m * tile_m + base) < total_rows, acc, 0.0)
        # Fold rows onto 8 sublanes with VPU adds; the single XLU reduce happens at the end.
        return part + jnp.sum(acc.reshape(dot_m // 8, 8, f_pad), axis=0)

    part = jax.lax.fori_loop(0, subs, sub_body,
                             jnp.zeros((8, f_pad), jnp.float32), unroll=True)
    pool8_ref[...] += part

    @pl.when(m == pl.num_programs(1) - 1)
    def _finalize():
        # Global average pool -> FC -> exact softmax over the real classes only.
        pooled = jnp.sum(pool8_ref[...], axis=0, keepdims=True) * inv_hw   # (1, f_pad)
        logits = jnp.dot(pooled, fcw_ref[...],
                         preferred_element_type=jnp.float32) + fcb_ref[...]
        lane = jax.lax.broadcasted_iota(jnp.int32, (1, cls_pad), 1)
        logits = jnp.where(lane < n_classes, logits, -1e30)                # mask pad classes
        mx = jnp.max(logits, axis=1, keepdims=True)
        e = jnp.exp(logits - mx)
        probs = e / jnp.sum(e, axis=1, keepdims=True)                      # exact divide
        o_ref[...] = jnp.broadcast_to(probs.reshape(1, 1, cls_pad), (1, 8, cls_pad))


@jax.jit
def classifier_forward(x_nchw, conv_w_hwio, conv_b, fc_w, fc_b):
    """x: (N,C,H,W) raw images.  conv_w: (3,3,C,F) HWIO (torch OIHW must be transposed).
    conv_b: (F,).  fc_w: (F, classes).  fc_b: (classes,).
    Returns (N, classes) softmax probabilities (rows sum to 1)."""
    N, C, H, W = x_nchw.shape
    KH, KW, C_w, F = conv_w_hwio.shape
    n_classes = fc_w.shape[1]
    assert (KH, KW) == (3, 3) and C_w == C == 3, "Normalize assumes 3-channel RGB input"

    f_pad = _round_up(max(F, 128), 128)
    cls_pad = _round_up(max(n_classes, 128), 128)

    mean = jnp.asarray(IMAGENET_MEAN, jnp.float32)
    inv_std = 1.0 / jnp.asarray(IMAGENET_STD, jnp.float32)

    # Fold transforms.Normalize into the conv:  W' = W/std,  b' = b - sum_{tap,c} W*mean/std.
    w_fold = conv_w_hwio * inv_std[None, None, :, None]
    b_fold = conv_b - jnp.einsum("hwcf,c->f", conv_w_hwio, mean * inv_std)

    wpack = jnp.zeros((K_PACK, f_pad), jnp.bfloat16)
    wpack = wpack.at[:KH * KW * C, :F].set(
        w_fold.reshape(KH * KW * C, F).astype(jnp.bfloat16))
    bias = jnp.zeros((1, f_pad), jnp.float32).at[0, :F].set(b_fold)
    fcw = jnp.zeros((f_pad, cls_pad), jnp.float32).at[:F, :n_classes].set(fc_w)
    fcb = jnp.zeros((1, cls_pad), jnp.float32).at[0, :n_classes].set(fc_b)

    # Mean-valued halo: the folded conv on the raw image with a mean halo reproduces the
    # reference conv (zero pad) on the *normalized* image exactly.
    x_nhwc = jnp.transpose(x_nchw, (0, 2, 3, 1)).astype(jnp.float32)
    xp = jnp.broadcast_to(mean.reshape(1, 1, 1, C), (N, H + 2, W + 2, C))
    xp = xp.at[:, 1:H + 1, 1:W + 1, :].set(x_nhwc)

    # Pack (kh, kw, c) into the contraction dim (27 -> 32): one lane-dense dot per tile.
    taps = [xp[:, kh:kh + H, kw:kw + W, :] for kh in range(3) for kw in range(3)]
    patches = jnp.stack(taps, axis=3).reshape(N, H * W, KH * KW * C)

    total = H * W
    dot_m = 256 if total >= 256 else _round_up(total, 8)   # per-dot M (acc stays in vregs)
    subs = min(8, -(-total // dot_m))                        # dots per grid step
    tile_m = dot_m * subs
    n_mtiles = -(-total // tile_m)
    padded_total = n_mtiles * tile_m

    patches_p = jnp.zeros((N, padded_total, K_PACK), jnp.bfloat16)
    patches_p = patches_p.at[:, :total, :KH * KW * C].set(patches.astype(jnp.bfloat16))

    kernel = functools.partial(
        _fused_forward_kernel,
        total_rows=total, dot_m=dot_m, subs=subs, tile_m=tile_m,
        f_pad=f_pad, cls_pad=cls_pad, n_classes=n_classes,
        inv_hw=1.0 / float(total), needs_mask=(padded_total != total))

    out = pl.pallas_call(
        kernel,
        out_shape=jax.ShapeDtypeStruct((N, 8, cls_pad), jnp.float32),
        grid=(N, n_mtiles),
        in_specs=[
            pl.BlockSpec((1, tile_m, K_PACK), lambda n, m: (n, m, 0)),
            pl.BlockSpec((K_PACK, f_pad), lambda n, m: (0, 0)),
            pl.BlockSpec((1, f_pad), lambda n, m: (0, 0)),
            pl.BlockSpec((f_pad, cls_pad), lambda n, m: (0, 0)),
            pl.BlockSpec((1, cls_pad), lambda n, m: (0, 0)),
        ],
        out_specs=pl.BlockSpec((1, 8, cls_pad), lambda n, m: (n, 0, 0)),
        scratch_shapes=[pltpu.VMEM((8, f_pad), jnp.float32)],
        compiler_params=pltpu.CompilerParams(
            dimension_semantics=("parallel", "arbitrary"),
            vmem_limit_bytes=32 * 1024 * 1024,
        ),
    )(patches_p, wpack, bias, fcw, fcb)

    return out[:, 0, :n_classes]


def _reference_forward(x_nchw, conv_w_hwio, conv_b, fc_w, fc_b):
    """Pure-JAX reference: Normalize -> conv(zero-pad) -> ReLU -> GAP -> FC -> softmax."""
    mean = jnp.asarray(IMAGENET_MEAN, jnp.float32).reshape(1, 3, 1, 1)
    std = jnp.asarray(IMAGENET_STD, jnp.float32).reshape(1, 3, 1, 1)
    xn = (x_nchw - mean) / std
    xn = jnp.transpose(xn, (0, 2, 3, 1))
    y = jax.lax.conv_general_dilated(
        xn, conv_w_hwio, window_strides=(1, 1), padding="SAME",
        dimension_numbers=("NHWC", "HWIO", "NHWC"))
    y = jnp.maximum(y + conv_b.reshape(1, 1, 1, -1), 0.0)
    pooled = jnp.mean(y, axis=(1, 2))
    logits = pooled @ fc_w + fc_b.reshape(1, -1)
    return jax.nn.softmax(logits, axis=1)


if __name__ == "__main__":
    key = jax.random.PRNGKey(0)
    N, C, H, W = 2, 3, 16, 16            # RGB images (Normalize hard-codes 3 channels)
    F = 32                               # synthetic backbone width (num_ftrs stand-in)
    CLASSES = 5                          # args.class_count

    k1, k2, k3, k4, k5 = jax.random.split(key, 5)
    x = jax.random.uniform(k1, (N, C, H, W), jnp.float32)               # images in [0, 1]
    conv_w = 0.1 * jax.random.normal(k2, (3, 3, C, F), jnp.float32)     # HWIO layout
    conv_b = 0.05 * jax.random.normal(k3, (F,), jnp.float32)
    fc_w = 0.1 * jax.random.normal(k4, (F, CLASSES), jnp.float32)
    fc_b = 0.01 * jax.random.normal(k5, (CLASSES,), jnp.float32)

    probs = jax.block_until_ready(classifier_forward(x, conv_w, conv_b, fc_w, fc_b))
    ref = jax.block_until_ready(_reference_forward(x, conv_w, conv_b, fc_w, fc_b))

    assert probs.shape == (N, CLASSES)
    assert bool(jnp.all(jnp.isfinite(probs)))
    assert bool(jnp.allclose(jnp.sum(probs, axis=1), 1.0, atol=1e-3))
    assert bool(jnp.allclose(probs, ref, atol=2e-2)), (probs, ref)
    print("KERNEL_OK")
</pallas_src>

<mosaic_0001>
module attributes {stable_mosaic.version = 11 : i64} {
  func.func @_fused_forward_kernel(%arg0: i32, %arg1: i32, %arg2: memref<1x256x32xbf16, #tpu.memory_space<vmem>>, %arg3: memref<32x128xbf16, #tpu.memory_space<vmem>>, %arg4: memref<1x128xf32, #tpu.memory_space<vmem>>, %arg5: memref<128x128xf32, #tpu.memory_space<vmem>>, %arg6: memref<1x128xf32, #tpu.memory_space<vmem>>, %arg7: memref<1x8x128xf32, #tpu.memory_space<vmem>>, %arg8: memref<8x128xf32, #tpu.memory_space<vmem>>) attributes {dimension_semantics = [#tpu.dimension_semantics<parallel>, #tpu.dimension_semantics<arbitrary>], iteration_bounds = array<i64: 2, 1>, scalar_prefetch = 0 : i64, scratch_operands = 1 : i64, tpu.core_type = #tpu.core_type<tc>, window_params = [{transform_indices = @transform_0, window_bounds = array<i64: 1, 256, 32>}, {pipeline_mode = #tpu.pipeline_mode<synchronous>, transform_indices = @transform_1, window_bounds = array<i64: 32, 128>}, {pipeline_mode = #tpu.pipeline_mode<synchronous>, transform_indices = @transform_2, window_bounds = array<i64: 1, 128>}, {pipeline_mode = #tpu.pipeline_mode<synchronous>, transform_indices = @transform_3, window_bounds = array<i64: 128, 128>}, {pipeline_mode = #tpu.pipeline_mode<synchronous>, transform_indices = @transform_4, window_bounds = array<i64: 1, 128>}, {transform_indices = @transform_5, window_bounds = array<i64: 1, 8, 128>}]} {
    %c0_i32 = arith.constant 0 : i32
    %0 = arith.cmpi eq, %arg1, %c0_i32 : i32
    %1 = arith.extui %0 : i1 to i32
    %c0_i32_0 = arith.constant 0 : i32
    %2 = arith.cmpi ne, %1, %c0_i32_0 : i32
    scf.if %2 {
      %cst_16 = arith.constant 0.000000e+00 : f32
      %25 = vector.broadcast %cst_16 : f32 to vector<8x128xf32>
      %c0_17 = arith.constant 0 : index
      %c0_18 = arith.constant 0 : index
      %26 = vector.load %arg8[%c0_17, %c0_18] : memref<8x128xf32, #tpu.memory_space<vmem>>, vector<8x128xf32>
      tpu.vector_store %arg8[%c0_17, %c0_18], %25 {strides = array<i32>} : memref<8x128xf32, #tpu.memory_space<vmem>>, vector<8x128xf32>,
    } else {
    }
    %c0 = arith.constant 0 : index
    %c0_1 = arith.constant 0 : index
    %3 = vector.load %arg3[%c0, %c0_1] : memref<32x128xbf16, #tpu.memory_space<vmem>>, vector<32x128xbf16>
    %c0_2 = arith.constant 0 : index
    %c0_3 = arith.constant 0 : index
    %4 = vector.load %arg4[%c0_2, %c0_3] : memref<1x128xf32, #tpu.memory_space<vmem>>, vector<1x128xf32>
    %cst = arith.constant 0.000000e+00 : f32
    %5 = vector.broadcast %cst : f32 to vector<8x128xf32>
    %c0_i32_4 = arith.constant 0 : i32
    %c256_i32 = arith.constant 256 : i32
    %6 = arith.muli %c0_i32_4, %c256_i32 : i32
    %7 = tpu.assume_multiple %6, 256 : i32
    %c0_5 = arith.constant 0 : index
    %8 = arith.index_cast %7 : i32 to index
    %c0_6 = arith.constant 0 : index
    %9 = vector.load %arg2[%c0_5, %8, %c0_6] : memref<1x256x32xbf16, #tpu.memory_space<vmem>>, vector<1x256x32xbf16>
    %10 = vector.shape_cast %9 : vector<1x256x32xbf16> to vector<256x32xbf16>
    %cst_7 = arith.constant dense<0.000000e+00> : vector<256x128xf32>
    %11 = tpu.matmul %10, %3, %cst_7 {dimension_numbers = #tpu.dot_dimension_numbers<[1], [0], [0], [1], [0, 0, 1, 1], [], []>} : vector<256x32xbf16>, vector<32x128xbf16>, vector<256x128xf32> -> vector<256x128xf32>
    %12 = vector.broadcast %4 : vector<1x128xf32> to vector<256x128xf32>
    %13 = arith.addf %11, %12 : vector<256x128xf32>
    %cst_8 = arith.constant 0.000000e+00 : f32
    %14 = vector.broadcast %cst_8 : f32 to vector<256x128xf32>
    %15 = arith.maximumf %13, %14 : vector<256x128xf32>
    %16 = vector.shape_cast %15 : vector<256x128xf32> to vector<32x8x128xf32>
    %cst_9 = arith.constant dense<0.000000e+00> : vector<8x128xf32>
    %17 = vector.multi_reduction <add>, %16, %cst_9 [0] : vector<32x8x128xf32> to vector<8x128xf32>
    %18 = arith.addf %5, %17 : vector<8x128xf32>
    %c1_i32 = arith.constant 1 : i32
    %c0_10 = arith.constant 0 : index
    %c0_11 = arith.constant 0 : index
    %19 = vector.load %arg8[%c0_10, %c0_11] : memref<8x128xf32, #tpu.memory_space<vmem>>, vector<8x128xf32>
    %20 = arith.addf %19, %18 : vector<8x128xf32>
    %c0_12 = arith.constant 0 : index
    %c0_13 = arith.constant 0 : index
    %21 = vector.load %arg8[%c0_12, %c0_13] : memref<8x128xf32, #tpu.memory_space<vmem>>, vector<8x128xf32>
    tpu.vector_store %arg8[%c0_12, %c0_13], %20 {strides = array<i32>} : memref<8x128xf32, #tpu.memory_space<vmem>>, vector<8x128xf32>,
    %c0_i32_14 = arith.constant 0 : i32
    %22 = arith.cmpi eq, %arg1, %c0_i32_14 : i32
    %23 = arith.extui %22 : i1 to i32
    %c0_i32_15 = arith.constant 0 : i32
    %24 = arith.cmpi ne, %23, %c0_i32_15 : i32
    scf.if %24 {
      %c0_16 = arith.constant 0 : index
      %c0_17 = arith.constant 0 : index
      %25 = vector.load %arg8[%c0_16, %c0_17] : memref<8x128xf32, #tpu.memory_space<vmem>>, vector<8x128xf32>
      %cst_18 = arith.constant dense<0.000000e+00> : vector<128xf32>
      %26 = vector.multi_reduction <add>, %25, %cst_18 [0] : vector<8x128xf32> to vector<128xf32>
      %27 = vector.shape_cast %26 : vector<128xf32> to vector<1x128xf32>
      %cst_19 = arith.constant 3.906250e-03 : f32
      %28 = vector.broadcast %cst_19 : f32 to vector<1x128xf32>
      %29 = arith.mulf %27, %28 : vector<1x128xf32>
      %c0_20 = arith.constant 0 : index
      %c0_21 = arith.constant 0 : index
      %30 = vector.load %arg5[%c0_20, %c0_21] : memref<128x128xf32, #tpu.memory_space<vmem>>, vector<128x128xf32>
      %cst_22 = arith.constant dense<0.000000e+00> : vector<1x128xf32>
      %31 = tpu.matmul %29, %30, %cst_22 {dimension_numbers = #tpu.dot_dimension_numbers<[1], [0], [0], [1], [0, 0, 1, 1], [], []>} : vector<1x128xf32>, vector<128x128xf32>, vector<1x128xf32> -> vector<1x128xf32>
      %c0_23 = arith.constant 0 : index
      %c0_24 = arith.constant 0 : index
      %32 = vector.load %arg6[%c0_23, %c0_24] : memref<1x128xf32, #tpu.memory_space<vmem>>, vector<1x128xf32>
      %33 = arith.addf %31, %32 : vector<1x128xf32>
      %34 = tpu.iota {dimensions = array<i32: 1>} : vector<1x128xi32>
      %c5_i32 = arith.constant 5 : i32
      %35 = vector.broadcast %c5_i32 : i32 to vector<1x128xi32>
      %36 = arith.cmpi slt, %34, %35 : vector<1x128xi32>
      %cst_25 = arith.constant -1.000000e+30 : f32
      %37 = vector.broadcast %cst_25 : f32 to vector<1x128xf32>
      %38 = arith.select %36, %33, %37 : vector<1x128xi1>, vector<1x128xf32>
      %cst_26 = arith.constant dense<0xFF800000> : vector<1xf32>
      %39 = vector.multi_reduction <maximumf>, %38, %cst_26 [1] : vector<1x128xf32> to vector<1xf32>
      %40 = vector.shape_cast %39 : vector<1xf32> to vector<1x1xf32>
      %41 = vector.broadcast %40 : vector<1x1xf32> to vector<1x128xf32>
      %42 = arith.subf %38, %41 : vector<1x128xf32>
      %43 = math.exp %42 : vector<1x128xf32>
      %cst_27 = arith.constant dense<0.000000e+00> : vector<1xf32>
      %44 = vector.multi_reduction <add>, %43, %cst_27 [1] : vector<1x128xf32> to vector<1xf32>
      %45 = vector.shape_cast %44 : vector<1xf32> to vector<1x1xf32>
      %46 = vector.broadcast %45 : vector<1x1xf32> to vector<1x128xf32>
      %47 = arith.divf %43, %46 : vector<1x128xf32>
      %48 = vector.shape_cast %47 : vector<1x128xf32> to vector<1x1x128xf32>
      %49 = vector.shape_cast %48 : vector<1x1x128xf32> to vector<1x1x128xf32>
      %50 = vector.broadcast %49 : vector<1x1x128xf32> to vector<1x8x128xf32>
      %c0_28 = arith.constant 0 : index
      %c0_29 = arith.constant 0 : index
      %c0_30 = arith.constant 0 : index
      %51 = vector.load %arg7[%c0_28, %c0_29, %c0_30] : memref<1x8x128xf32, #tpu.memory_space<vmem>>, vector<1x8x128xf32>
      tpu.vector_store %arg7[%c0_28, %c0_29, %c0_30], %50 {strides = array<i32>} : memref<1x8x128xf32, #tpu.memory_space<vmem>>, vector<1x8x128xf32>,
    } else {
    }
    return
  }
  func.func @transform_0(%arg0: i32, %arg1: i32) -> (i32, i32, i32) {
    %c0_i32 = arith.constant 0 : i32
    %c0_i32_0 = arith.constant 0 : i32
    return %arg0, %arg1, %c0_i32 : i32, i32, i32
  }
  func.func @transform_1(%arg0: i32, %arg1: i32) -> (i32, i32) {
    %c0_i32 = arith.constant 0 : i32
    %c0_i32_0 = arith.constant 0 : i32
    %c0_i32_1 = arith.constant 0 : i32
    return %c0_i32, %c0_i32_0 : i32, i32
  }
  func.func @transform_2(%arg0: i32, %arg1: i32) -> (i32, i32) {
    %c0_i32 = arith.constant 0 : i32
    %c0_i32_0 = arith.constant 0 : i32
    %c0_i32_1 = arith.constant 0 : i32
    return %c0_i32, %c0_i32_0 : i32, i32
  }
  func.func @transform_3(%arg0: i32, %arg1: i32) -> (i32, i32) {
    %c0_i32 = arith.constant 0 : i32
    %c0_i32_0 = arith.constant 0 : i32
    %c0_i32_1 = arith.constant 0 : i32
    return %c0_i32, %c0_i32_0 : i32, i32
  }
  func.func @transform_4(%arg0: i32, %arg1: i32) -> (i32, i32) {
    %c0_i32 = arith.constant 0 : i32
    %c0_i32_0 = arith.constant 0 : i32
    %c0_i32_1 = arith.constant 0 : i32
    return %c0_i32, %c0_i32_0 : i32, i32
  }
  func.func @transform_5(%arg0: i32, %arg1: i32) -> (i32, i32, i32) {
    %c0_i32 = arith.constant 0 : i32
    %c0_i32_0 = arith.constant 0 : i32
    %c0_i32_1 = arith.constant 0 : i32
    return %arg0, %c0_i32, %c0_i32_0 : i32, i32, i32
  }
}

</mosaic_0001>

<bundles_post_ra>
// kernel: classifier_forward.1
= control target key start
LH: loop header
LB: loop body
LE: loop exit
PB: predicated region body
PF: predicated region fallthrough
CT: control target
= control target key end

     0   :  { %s946_s18 = smov 0   ;;  %s948_s19 = smov 0   ;;  %s1147_s0 = inlined_call_operand.vmem [shape: bf16[2,256,32], index: 0, kind: input, shape index: {}]   ;;  %s1148_s1 = inlined_call_operand.vmem [shape: bf16[32,128], index: 1, kind: input, shape index: {}]   ;;  %s1149_s2 = inlined_call_operand.vmem [shape: f32[1,128], index: 2, kind: input, shape index: {}]   ;;  %s1150_s3 = inlined_call_operand.vmem [shape: f32[128,128], index: 3, kind: input, shape index: {}]   ;;  %s1151_s4 = inlined_call_operand.vmem [shape: f32[1,128], index: 4, kind: input, shape index: {}]   ;;  %s1152_s5 = inlined_call_operand.vmem [shape: f32[2,8,128], index: 5, kind: output, shape index: {}]  }
   0x1   :  { %s950_s20 = smov 0  }
   0x2 LB: > { %s27_s21 = sadd.s32 1, %s910_s19  ;;  %p744_p0 = scmp.ge.s32.totalorder %s914_s20, 1  ;;  %s914_s20 = sphi %s950_s20, %s15_s20   ;;  %s910_s19 = sphi %s948_s19, %s1154_s19   ;;  %s906_s18 = sphi %s946_s18, %s1153_s18  }
   0x3   : > { %p29_p1 = scmp.ge.s32.totalorder %s27_s21, 2  ;;  %p206_p2 = scmp.lt.s32.totalorder %s914_s20, 3 }
   0x5   : > { %s1156_s21 = smov (%p29_p1, %s27_s21), 0  ;;  %p207_p3 = pnand %p744_p0, %p206_p2 }
   0x6   : > { %p238_p4 = scmp.lt.s32.totalorder (!%p207_p3), %s906_s18, 1 }
   0x7   : > { %210 = sbr.rel (%p207_p3) target bundleno = 678 (0x2a6), region = 40 }
   0xc   : > { %v840_v0 = vld [vmem:[%s1148_s1 + $0x8] sm:$0xff]  ;;  %v839_v1 = vld [vmem:[%s1148_s1] sm:$0xff]  ;;  %s1158_s18 = smov (!%p238_p4, %s906_s18), 1  ;;  %vm389_vm0 = vcmask 261120   ;;  %vm646_vm2 = vcmask 1040384  }
   0xd   : > { %444 = vmatpush.bf16.msra.mxu0 %v840_v0  ;;  %858 = vmatpush.bf16.msra.mxu2 %v840_v0  ;;  %s838_s26 = sshll.u32 %s1158_s18, 7  ;;  %v1025_v32 = vld [vmem:[%s1149_s2] ss:$0 sm:$0xff]  ;;  %s747_s24 = sshll.u32 %s1158_s18, 3 }
   0xe   : > { %859 = vmatpush.bf16.msra.mxu3 %v840_v0  ;;  %857 = vmatpush.bf16.msra.mxu1 %v840_v0  ;;  %s976_s29 = scalar_lea.vmem %s1147_s0, %s838_s26  ;;  %s250_s27 = scalar_lea.vmem %s1152_s5, %s747_s24 }
   0xf   : > { %v841_v2 = vld [vmem:[%s976_s29] sm:$0xff]  ;;  %v848_v3 = vld [vmem:[%s976_s29 + $0x38] sm:$0xff]  ;;  %v842_v5 = vld [vmem:[%s976_s29 + $0x8] sm:$0xff] }
  0x10   : > { %v853_v4 = vld [vmem:[%s976_s29 + $0x60] sm:$0xff]  ;;  %v846_v7 = vld [vmem:[%s976_s29 + $0x28] sm:$0xff]  ;;  %v843_v9 = vld [vmem:[%s976_s29 + $0x10] sm:$0xff] }
  0x11   : > { %445 = vmatpush.bf16.msra.mxu0 %v839_v1  ;;  %861 = vmatpush.bf16.msra.mxu2 %v839_v1  ;;  %v849_v6 = vld [vmem:[%s976_s29 + $0x40] sm:$0xff]  ;;  %v854_v8 = vld [vmem:[%s976_s29 + $0x68] sm:$0xff]  ;;  %v847_v11 = vld [vmem:[%s976_s29 + $0x30] sm:$0xff] }
  0x12   : > { %862 = vmatpush.bf16.msra.mxu3 %v839_v1  ;;  %860 = vmatpush.bf16.msra.mxu1 %v839_v1  ;;  %v850_v10 = vld [vmem:[%s976_s29 + $0x48] sm:$0xff]  ;;  %v855_v12 = vld [vmem:[%s976_s29 + $0x70] sm:$0xff]  ;;  %v844_v13 = vld [vmem:[%s976_s29 + $0x18] sm:$0xff] }
  0x13   : > { %v851_v14 = vld [vmem:[%s976_s29 + $0x50] sm:$0xff]  ;;  %v856_v15 = vld [vmem:[%s976_s29 + $0x78] sm:$0xff]  ;;  %v845_v16 = vld [vmem:[%s976_s29 + $0x20] sm:$0xff] }
  0x14   : > { %820 = vmatmul.msk.bf16.vlgmr.msra.gmra.mxu0 %vm389_vm0, %v841_v2  ;;  %827 = vmatmul.msk.bf16.vlgmr.msra.gmra.mxu2 %vm389_vm0, %v848_v3  ;;  %v852_v17 = vld [vmem:[%s976_s29 + $0x58] sm:$0xff] }
  0x15   : > { %832 = vmatmul.msk.bf16.vlgmr.msra.gmra.mxu3 %vm389_vm0, %v853_v4  ;;  %825 = vmatmul.msk.bf16.vlgmr.msra.gmra.mxu1 %vm389_vm0, %v846_v7 }
  0x24   : > { %821 = vmatmul.msk.bf16.gmra.mxu0 %vm389_vm0, %v842_v5  ;;  %828 = vmatmul.msk.bf16.gmra.mxu2 %vm389_vm0, %v849_v6  ;;  %v620_v6 = vld [vmem:[%s1150_s3 + $0x78] sm:$0xff] }
  0x25   : > { %833 = vmatmul.msk.bf16.gmra.mxu3 %vm389_vm0, %v854_v8  ;;  %826 = vmatmul.msk.bf16.gmra.mxu1 %vm389_vm0, %v847_v11 }
  0x26   : > { %622 = vmatpush.msrb.mxu1 %v620_v6  ;;  %v606_v6 = vld [vmem:[%s1150_s3 + $0x8] sm:$0xff] }
  0x34   : > { %822 = vmatmul.msk.bf16.gmra.mxu0 %vm389_vm0, %v843_v9  ;;  %829 = vmatmul.msk.bf16.gmra.mxu2 %vm389_vm0, %v850_v10  ;;  %v619_v10 = vld [vmem:[%s1150_s3 + $0x70] sm:$0xff] }
  0x35   : > { %834 = vmatmul.msk.bf16.gmra.mxu3 %vm389_vm0, %v855_v12  ;;  %623 = vmatpush.msrb.mxu1 %v619_v10  ;;  %v605_v10 = vld [vmem:[%s1150_s3] sm:$0xff] }
  0x44   : > { %823 = vmatmul.msk.bf16.gmra.mxu0 %vm389_vm0, %v844_v13  ;;  %830 = vmatmul.msk.bf16.gmra.mxu2 %vm389_vm0, %v851_v14 }
  0x45   : > { %835 = vmatmul.msk.bf16.gmra.mxu3 %vm389_vm0, %v856_v15 }
  0x54   : > { %824 = vmatmul.msk.bf16.gmra.mxu0 %vm389_vm0, %v845_v16  ;;  %831 = vmatmul.msk.bf16.gmra.mxu2 %vm389_vm0, %v852_v17  ;;  %v618_v16 = vld [vmem:[%s1150_s3 + $0x68] sm:$0xff] }
  0x55   : > { %624 = vmatpush.msrb.mxu1 %v618_v16 }
  0x91   : > { %v447_v18 = vpop.f32.mrf.mxu0 }
  0x92   : > { %v472_v29 = vpop.f32.mrf.mxu1  ;;  %v448_v35 = vadd.f32 %v1025_v32, %v447_v18 }
  0x93   : > { %v473_v3 = vadd.f32 %v1025_v32, %v472_v29  ;;  %v616_v29 = vld [vmem:[%s1150_s3 + $0x58] sm:$0xff] }
  0x94   : > { %v527_v42 = vmax.f32 %v448_v35, 0.0 }
  0x95   : > { %v537_v13 = vmax.f32 %v473_v3, 0.0 }
  0x97   : > { %v1010_v19 = vpop.f32.mrf.mxu2 }
  0x98   : > { %v1018_v28 = vpop.f32.mrf.mxu3 }
  0x99   : > { %v449_v20 = vpop.f32.mrf.mxu0 }
  0x9a   : > { %v450_v34 = vadd.f32 %v1025_v32, %v449_v20  ;;  %v474_v37 = vpop.f32.mrf.mxu1 }
  0x9b   : > { %v475_v7 = vadd.f32 %v1025_v32, %v474_v37  ;;  %v615_v37 = vld [vmem:[%s1150_s3 + $0x50] sm:$0xff] }
  0x9c   : > { %v528_v40 = vmax.f32 %v450_v34, 0.0 }
  0x9d   : > { %v538_v17 = vmax.f32 %v475_v7, 0.0  ;;  %v508_v7 = vadd.f32 %v1025_v32, %v1018_v28 }
  0x9e   : > { %v559_v45 = vadd.f32 %v528_v40, %v527_v42 }
  0x9f   : > { %v1012_v22 = vpop.f32.mrf.mxu2 }
  0xa0   : > { %v1027_v33 = vpop.f32.mrf.mxu3  ;;  %v485_v34 = vadd.f32 %v1025_v32, %v1012_v22 }
  0xa1   : > { %v452_v21 = vpop.f32.mrf.mxu0 }
  0xa2   : > { %v453_v36 = vadd.f32 %v1025_v32, %v452_v21  ;;  %v477_v56 = vpop.f32.mrf.mxu1  ;;  %v617_v21 = vld [vmem:[%s1150_s3 + $0x60] sm:$0xff] }
  0xa3   : > { %v478_v14 = vadd.f32 %v1025_v32, %v477_v56  ;;  %625 = vmatpush.msrb.mxu1 %v617_v21  ;;  %v610_v56 = vld [vmem:[%s1150_s3 + $0x28] sm:$0xff] }
  0xa4   : > { %v529_v43 = vmax.f32 %v453_v36, 0.0 }
  0xa5   : > { %626 = vmatpush.msrb.mxu1 %v616_v29 }
  0xa6   : > { %v560_v49 = vadd.f32 %v559_v45, %v529_v43  ;;  %v542_v43 = vmax.f32 %v485_v34, 0.0  ;;  %v613_v45 = vld [vmem:[%s1150_s3 + $0x40] sm:$0xff] }
  0xa7   : > { %v1014_v24 = vpop.f32.mrf.mxu2  ;;  %627 = vmatpush.msrb.mxu1 %v615_v37 }
  0xa8   : > { %v1037_v48 = vpop.f32.mrf.mxu3 }
  0xa9   : > { %v454_v23 = vpop.f32.mrf.mxu0  ;;  %v513_v16 = vadd.f32 %v1025_v32, %v1037_v48 }
  0xaa   : > { %v455_v41 = vadd.f32 %v1025_v32, %v454_v23  ;;  %v479_v11 = vpop.f32.mrf.mxu1  ;;  %v483_v23 = vadd.f32 %v1025_v32, %v1010_v19 }
  0xab   : > { %v480_v20 = vadd.f32 %v1025_v32, %v479_v11  ;;  %v553_v21 = vmax.f32 %v513_v16, 0.0 }
  0xac   : > { %v530_v46 = vmax.f32 %v455_v41, 0.0  ;;  %v541_v19 = vmax.f32 %v483_v23, 0.0  ;;  %v614_v41 = vld [vmem:[%s1150_s3 + $0x48] sm:$0xff] }
  0xad   : > { %v540_v35 = vmax.f32 %v480_v20, 0.0  ;;  %628 = vmatpush.msrb.mxu1 %v614_v41 }
  0xae   : > { %v561_v53 = vadd.f32 %v560_v49, %v530_v46  ;;  %v612_v49 = vld [vmem:[%s1150_s3 + $0x38] sm:$0xff] }
  0xaf   : > { %v1016_v26 = vpop.f32.mrf.mxu2  ;;  %629 = vmatpush.msrb.mxu1 %v613_v45 }
  0xb0   : > { %v1044_v2 = vpop.f32.mrf.mxu3  ;;  %v490_v22 = vadd.f32 %v1025_v32, %v1016_v26 }
  0xb1   : > { %v457_v25 = vpop.f32.mrf.mxu0  ;;  %630 = vmatpush.msrb.mxu1 %v612_v49  ;;  %v642_v49 = vlaneseq }
  0xb2   : > { %v458_v44 = vadd.f32 %v1025_v32, %v457_v25  ;;  %v539_v25 = vmax.f32 %v478_v14, 0.0 }
  0xb4   : > { %v531_v50 = vmax.f32 %v458_v44, 0.0 }
  0xb6   : > { %v562_v58 = vadd.f32 %v561_v53, %v531_v50  ;;  %v544_v50 = vmax.f32 %v490_v22, 0.0 }
  0xb7   : > { %v1020_v30 = vpop.f32.mrf.mxu2 }
  0xb9   : > { %v459_v27 = vpop.f32.mrf.mxu0 }
  0xba   : > { %v460_v47 = vadd.f32 %v1025_v32, %v459_v27 }
  0xbc   : > { %v532_v54 = vmax.f32 %v460_v47, 0.0 }
  0xbe   : > { %v563_v61 = vadd.f32 %v562_v58, %v532_v54 }
  0xbf   : > { %v1032_v39 = vpop.f32.mrf.mxu2 }
  0xc0   : > { %v495_v26 = vadd.f32 %v1025_v32, %v1032_v39 }
  0xc1   : > { %v462_v31 = vpop.f32.mrf.mxu0 }
  0xc2   : > { %v463_v51 = vadd.f32 %v1025_v32, %v462_v31  ;;  %v1068_v31 = vpop.f32.mrf.mxu3  ;;  %v546_v58 = vmax.f32 %v495_v26, 0.0  ;;  %v621_v26 = vld [vmem:[%s1151_s4] sm:$0x1] }
  0xc3   : > { %v518_v23 = vadd.f32 %v1025_v32, %v1068_v31 }
  0xc4   : > { %v533_v59 = vmax.f32 %v463_v51, 0.0 }
  0xc6   : > { %v564_v63 = vadd.f32 %v563_v61, %v533_v59  ;;  %v608_v61 = vld [vmem:[%s1150_s3 + $0x18] sm:$0xff] }
  0xc7   : > { %v1041_v57 = vpop.f32.mrf.mxu2 }
  0xc9   : > { %v464_v38 = vpop.f32.mrf.mxu0 }
  0xca   : > { %v465_v55 = vadd.f32 %v1025_v32, %v464_v38  ;;  %v488_v38 = vadd.f32 %v1025_v32, %v1014_v24  ;;  %v493_v24 = vadd.f32 %v1025_v32, %v1020_v30  ;;  %v519_v53 = vpop.f32.mrf.mxu3  ;;  %v498_v30 = vadd.f32 %v1025_v32, %v1041_v57 }
  0xcc   : > { %v534_v62 = vmax.f32 %v465_v55, 0.0  ;;  %v543_v46 = vmax.f32 %v488_v38, 0.0  ;;  %v545_v54 = vmax.f32 %v493_v24, 0.0  ;;  %v547_v57 = vmax.f32 %v498_v30, 0.0 }
  0xce   : > { %v565_v4 = vadd.f32 %v564_v63, %v534_v62 }
  0xcf   : > { %v499_v12 = vpop.f32.mrf.mxu2 }
  0xd0   : > { %v500_v39 = vadd.f32 %v1025_v32, %v499_v12  ;;  %v510_v12 = vadd.f32 %v1025_v32, %v1027_v33  ;;  %v520_v33 = vadd.f32 %v1025_v32, %v519_v53 }
  0xd1   : > { %v467_v52 = vpop.f32.mrf.mxu0 }
  0xd2   : > { %v468_v60 = vadd.f32 %v1025_v32, %v467_v52  ;;  %v611_v52 = vld [vmem:[%s1150_s3 + $0x30] sm:$0xff]  ;;  %v548_v3 = vmax.f32 %v500_v39, 0.0  ;;  %v522_v11 = vpop.f32.mrf.mxu3  ;;  %v552_v28 = vmax.f32 %v510_v12, 0.0  ;;  %v556_v37 = vmax.f32 %v520_v33, 0.0 }
  0xd3   : > { %631 = vmatpush.msrb.mxu1 %v611_v52  ;;  %v523_v48 = vadd.f32 %v1025_v32, %v522_v11 }
  0xd4   : > { %v535_v0 = vmax.f32 %v468_v60, 0.0  ;;  %v609_v60 = vld [vmem:[%s1150_s3 + $0x20] sm:$0xff] }
  0xd5   : > { %632 = vmatpush.msrb.mxu1 %v610_v56 }
  0xd6   : > { %v566_v8 = vadd.f32 %v565_v4, %v535_v0 }
  0xd7   : > { %v502_v42 = vpop.f32.mrf.mxu2  ;;  %633 = vmatpush.msrb.mxu1 %v609_v60 }
  0xd8   : > { %v503_v0 = vadd.f32 %v1025_v32, %v502_v42 }
  0xd9   : > { %v469_v1 = vpop.f32.mrf.mxu0  ;;  %634 = vmatpush.msrb.mxu1 %v608_v61 }
  0xda   : > { %v470_v5 = vadd.f32 %v1025_v32, %v469_v1  ;;  %v607_v1 = vld [vmem:[%s1150_s3 + $0x10] sm:$0xff]  ;;  %v524_v34 = vpop.f32.mrf.mxu3 }
  0xdb   : > { %635 = vmatpush.msrb.mxu1 %v607_v1  ;;  %v525_v38 = vadd.f32 %v1025_v32, %v524_v34 }
  0xdc   : > { %v536_v9 = vmax.f32 %v470_v5, 0.0 }
  0xdd   : > { %636 = vmatpush.msrb.mxu1 %v606_v6  ;;  %v558_v42 = vmax.f32 %v525_v38, 0.0 }
  0xde   : > { %v567_v15 = vadd.f32 %v566_v8, %v536_v9  ;;  %v549_v9 = vmax.f32 %v503_v0, 0.0 }
  0xdf   : > { %v504_v62 = vpop.f32.mrf.mxu2  ;;  %637 = vmatpush.msrb.mxu1 %v605_v10 }
  0xe0   : > { %v568_v18 = vadd.f32 %v567_v15, %v537_v13  ;;  %v505_v5 = vadd.f32 %v1025_v32, %v504_v62  ;;  %v551_v15 = vmax.f32 %v508_v7, 0.0 }
  0xe2   : > { %v569_v27 = vadd.f32 %v568_v18, %v538_v17  ;;  %v550_v14 = vmax.f32 %v505_v5, 0.0  ;;  %v515_v18 = vadd.f32 %v1025_v32, %v1044_v2 }
  0xe4   : > { %v570_v36 = vadd.f32 %v569_v27, %v539_v25  ;;  %v554_v27 = vmax.f32 %v515_v18, 0.0 }
  0xe6   : > { %v571_v40 = vadd.f32 %v570_v36, %v540_v35  ;;  %v555_v35 = vmax.f32 %v518_v23, 0.0 }
  0xe8   : > { %v572_v44 = vadd.f32 %v571_v40, %v541_v19  ;;  %v557_v40 = vmax.f32 %v523_v48, 0.0 }
  0xea   : > { %v573_v47 = vadd.f32 %v572_v44, %v542_v43 }
  0xec   : > { %v574_v51 = vadd.f32 %v573_v47, %v543_v46 }
  0xee   : > { %v575_v55 = vadd.f32 %v574_v51, %v544_v50  ;;  %v643_v50 = vand.u32 127, %v642_v49 }
  0xf0   : > { %v576_v59 = vadd.f32 %v575_v55, %v545_v54  ;;  %vm644_vm1 = vcmp.lt.s32.totalorder %v643_v50, 5 }
  0xf2   : > { %v577_v63 = vadd.f32 %v576_v59, %v546_v58 }
  0xf4   : > { %v578_v4 = vadd.f32 %v577_v63, %v547_v57 }
  0xf6   : > { %v579_v8 = vadd.f32 %v578_v4, %v548_v3 }
  0xf8   : > { %v580_v13 = vadd.f32 %v579_v8, %v549_v9 }
  0xfa   : > { %v581_v17 = vadd.f32 %v580_v13, %v550_v14 }
  0xfc   : > { %v582_v20 = vadd.f32 %v581_v17, %v551_v15 }
  0xfe   : > { %v583_v25 = vadd.f32 %v582_v20, %v552_v28 }
 0x100   : > { %v584_v29 = vadd.f32 %v583_v25, %v553_v21 }
 0x102   : > { %v585_v36 = vadd.f32 %v584_v29, %v554_v27 }
 0x104   : > { %v586_v19 = vadd.f32 %v585_v36, %v555_v35 }
 0x106   : > { %v587_v2 = vadd.f32 %v586_v19, %v556_v37 }
 0x108   : > { %v588_v41 = vadd.f32 %v587_v2, %v557_v40 }
 0x10a   : > { %v589_v43 = vadd.f32 %v588_v41, %v558_v42 }
 0x10c   : > { %v598_v31 = vrot.slane %v589_v43, 4 }
 0x10e   : > { %v599_v22 = vadd.f32 %v598_v31, %v589_v43 }
 0x110   : > { %v600_v44 = vrot.slane %v599_v22, 2 }
 0x112   : > { %v601_v45 = vadd.f32 %v600_v44, %v599_v22 }
 0x114   : > { %v602_v46 = vrot.slane %v601_v45, 1 }
 0x116   : > { %v603_v24 = vadd.f32 %v602_v46, %v601_v45 }
 0x118   : > { %v604_v47 = vmul.f32 0.00390625, %v603_v24 }
 0x11a   : > { %638 = vmatmul.f32.vlgmr.msrb.gmra.mxu1 %v604_v47 }
 0x197   : > { %v639_v32 = vpop.f32.mrf.mxu1 }
 0x198   : > { %v640_v51 = vadd.f32 %v639_v32, %v621_v26 }
 0x19a   : > { %v645_v52 = vsel %vm644_vm1, %v640_v51, -1e+30 }
 0x19b   : > { %v647_v53 = vsel %vm646_vm2, %v645_v52, -inf }
 0x19c   : > { %648 = vmax.xlane.f32.xlu0 %v647_v53 }
 0x20f   : > { %v649_v54 = vpop.xlane.xlu0 %648 }
 0x210   : > { %v650_v30 = vsub.f32 %v645_v52, %v649_v54 }
 0x212   : > { %v651_v55 = vmul.f32 1.442695, %v650_v30 }
 0x214   : > { %888 = vpow2.f32 %v651_v55 }
 0x21a   : > { %v889_v56 = vpop.eup %888 }
 0x21b   : > { %v653_v58 = vsel %vm646_vm2, %v889_v56, 0.0 }
 0x21c   : > { %654 = vadd.xlane.f32.xlu0 %v653_v58 }
 0x28f   : > { %v655_v39 = vpop.xlane.xlu0 %654 }
 0x290   : > { %890 = vrcp.f32 %v655_v39  ;;  %v667_v62 = vand.u32 2147483648, %v655_v39  ;;  %v665_v63 = vand.u32 2147483647, %v655_v39  ;;  %vm661_vm4 = vweird.f32 %v655_v39 }
 0x292   : > { %v668_v1 = vor.u32 1.1754944e-38, %v667_v62  ;;  %vm666_vm6 = vcmp.eq.f32.partialorder %v665_v63, 8.507059e+37 }
 0x296   : > { %v891_v59 = vpop.eup %890 }
 0x297   : > { %v657_v60 = vmul.f32 %v891_v59, %v655_v39  ;;  %vm662_vm3 = vweird.f32 %v891_v59 }
 0x298   : > { %vm663_vm5 = vmor %vm661_vm4, %vm662_vm3 }
 0x299   : > { %v658_v61 = vsub.f32 1.0, %v657_v60 }
 0x29b   : > { %v659_v57 = vmul.f32 %v891_v59, %v658_v61 }
 0x29d   : > { %v660_v0 = vadd.f32 %v891_v59, %v659_v57 }
 0x29f   : > { %v664_v3 = vsel %vm663_vm5, %v891_v59, %v660_v0 }
 0x2a0   : > { %v669_v4 = vsel %vm666_vm6, %v668_v1, %v664_v3 }
 0x2a1   : > { %v670_v5 = vmul.f32 %v889_v56, %v669_v4 }
 0x2a3   : > { %v671_v6 = vperm.slane %v670_v5, 0 }
 0x2a5   : > { %672 = vst [vmem:[%s250_s27] sm:$0xff] %v671_v6 }
 0x2a6 PF: > { %s15_s20 = sadd.s32 1, %s914_s20   ;;  %s1153_s18 = smov %s910_s19 }
 0x2a7   : > { %p12_p5 = scmp.ge.s32.totalorder %s15_s20, 4   ;;  %s1154_s19 = smov %s1156_s21 }
 0x2a9   :  { %14 = sbr.rel (!%p12_p5) target bundleno = 2 (0x2), region = 78 }

</bundles_post_ra>
